<compile_context>
chip_gen: v7x
topology: tpu7x:2x2x1
jax: 0.10.0
libtpu: 0.0.40
codegen_flags: <defaults>
</compile_context>

<pallas_src>
import functools

import jax
import jax.numpy as jnp
from jax.experimental import pallas as pl
from jax.experimental.pallas import tpu as pltpu

F32 = jnp.float32
BF16 = jnp.bfloat16


def _rup(x, m):
    return ((x + m - 1) // m) * m


def _device_kind():
    try:
        return jax.devices()[0].device_kind.lower()
    except Exception:
        return ""


_DEV_KIND = _device_kind()
_IS_V5E = ("v5 lite" in _DEV_KIND) or ("v5e" in _DEV_KIND) or ("v5litepod" in _DEV_KIND)


# ---------------------------------------------------------------------------
# Tiled matmul with fused bias + activation (MXU).  bf16 in/out, f32 accum.
# ---------------------------------------------------------------------------
def _apply_act(r, act):
    if act == "relu":
        return jnp.maximum(r, 0.0)
    if act == "sigmoid":
        return jax.nn.sigmoid(r)
    if act == "tanh":
        return jnp.tanh(r)
    return r


def _mm_kernel_single(a_ref, b_ref, bias_ref, o_ref, *, act):
    r = jnp.dot(a_ref[...], b_ref[...], preferred_element_type=jnp.float32)
    o_ref[...] = _apply_act(r + bias_ref[...], act).astype(o_ref.dtype)


def _mm_kernel_multi(a_ref, b_ref, bias_ref, o_ref, acc_ref, *, act, nk):
    k = pl.program_id(2)

    @pl.when(k == 0)
    def _():
        acc_ref[...] = jnp.zeros_like(acc_ref)

    acc_ref[...] += jnp.dot(a_ref[...], b_ref[...],
                            preferred_element_type=jnp.float32)

    @pl.when(k == nk - 1)
    def _():
        o_ref[...] = _apply_act(acc_ref[...] + bias_ref[...], act).astype(o_ref.dtype)


@functools.lru_cache(maxsize=None)
def _matmul_fn(Mp, Kp, Np, tm, tk, tn, act, out_dtype):
    nk = Kp // tk
    if nk == 1:
        f = pl.pallas_call(
            functools.partial(_mm_kernel_single, act=act),
            out_shape=jax.ShapeDtypeStruct((Mp, Np), out_dtype),
            grid_spec=pltpu.PrefetchScalarGridSpec(
                num_scalar_prefetch=0,
                grid=(Mp // tm, Np // tn),
                in_specs=[
                    pl.BlockSpec((tm, tk), lambda i, j: (i, 0)),
                    pl.BlockSpec((tk, tn), lambda i, j: (0, j)),
                    pl.BlockSpec((1, tn), lambda i, j: (0, j)),
                ],
                out_specs=pl.BlockSpec((tm, tn), lambda i, j: (i, j)),
            ),
            compiler_params=pltpu.CompilerParams(
                dimension_semantics=("parallel", "parallel")),
        )
    else:
        f = pl.pallas_call(
            functools.partial(_mm_kernel_multi, act=act, nk=nk),
            out_shape=jax.ShapeDtypeStruct((Mp, Np), out_dtype),
            grid_spec=pltpu.PrefetchScalarGridSpec(
                num_scalar_prefetch=0,
                grid=(Mp // tm, Np // tn, nk),
                in_specs=[
                    pl.BlockSpec((tm, tk), lambda i, j, k: (i, k)),
                    pl.BlockSpec((tk, tn), lambda i, j, k: (k, j)),
                    pl.BlockSpec((1, tn), lambda i, j, k: (0, j)),
                ],
                out_specs=pl.BlockSpec((tm, tn), lambda i, j, k: (i, j)),
                scratch_shapes=[pltpu.VMEM((tm, tn), F32)],
            ),
            compiler_params=pltpu.CompilerParams(
                dimension_semantics=("parallel", "parallel", "arbitrary")),
        )
    return jax.jit(f)


def _choose_m(M):
    if M <= 256:
        tm = _rup(M, 16)            # bf16 sublane packing granularity
        return tm, tm
    for tm in (512, 256, 128):      # large output-stationary tiles: fewer B re-streams
        if M % tm == 0:
            return tm, M
    tm = 256
    return tm, _rup(M, tm)


def _choose_n(N):
    Np = _rup(N, 128)
    cap = 128 if _IS_V5E else 512   # v5e MXU is 128-wide; v6e/v7x 256-wide
    for t in (512, 256, 128):
        if t <= cap and Np % t == 0:
            return t, Np
    return 128, Np


def _choose_k(K, tm, tn):
    """Largest 128-multiple K tile dividing Kp inside a VMEM budget."""
    Kp = _rup(K, 128)
    budget = 12 << 20                               # bytes for K-streamed A/B blocks
    max_tk = (budget // ((tm + tn) * 2 * 2)) // 128 * 128
    max_tk = max(512, min(max_tk, 8192))
    if Kp <= max_tk:
        return Kp, Kp                               # single-pass full K
    t = max_tk
    best = 128
    while t >= 128:
        if Kp % t == 0:
            best = t
            break
        t -= 128
    if best < 1024:                                 # no decent divisor -> re-pad K
        tk = min(max_tk, 2048)
        Kp2 = _rup(K, tk)
        if Kp2 - Kp <= max(Kp // 8, 256):
            return tk, Kp2
    return best, Kp


def pallas_matmul(a, b, bias=None, act="none", out_dtype=BF16):
    """(M,K) @ (K,N) + bias with fused activation on the MXU (bf16 out)."""
    M, K = a.shape
    K2, N = b.shape
    assert K == K2
    tm, Mp = _choose_m(M)
    tn, Np = _choose_n(N)
    tk, Kp = _choose_k(K, tm, tn)

    a_p = a if a.dtype == BF16 else a.astype(BF16)
    if (Mp, Kp) != (M, K):
        a_p = jnp.pad(a_p, ((0, Mp - M), (0, Kp - K)))
    b_p = b if b.dtype == BF16 else b.astype(BF16)
    if (Kp, Np) != (K, N):
        b_p = jnp.pad(b_p, ((0, Kp - K), (0, Np - N)))
    if bias is None:
        bias_p = jnp.zeros((1, Np), F32)
    else:
        bias_p = jnp.pad(bias.astype(F32), (0, Np - N)).reshape(1, Np)

    out = _matmul_fn(Mp, Kp, Np, tm, tk, tn, act, out_dtype)(a_p, b_p, bias_p)
    if (Mp, Np) != (M, N):
        out = out[:M, :N]
    return out


# ---------------------------------------------------------------------------
# Batched matmul (pixel correlation), tiled over (batch, row blocks), bf16.
# ---------------------------------------------------------------------------
def _bmm_kernel(a_ref, b_ref, o_ref):
    o_ref[0, :, :] = jnp.dot(a_ref[0], b_ref[0],
                             preferred_element_type=jnp.float32).astype(o_ref.dtype)


@functools.lru_cache(maxsize=None)
def _bmm_fn(B, Mp, K, N, tmb):
    f = pl.pallas_call(
        _bmm_kernel,
        out_shape=jax.ShapeDtypeStruct((B, Mp, N), BF16),
        grid=(B, Mp // tmb),
        in_specs=[pl.BlockSpec((1, tmb, K), lambda b, m: (b, m, 0)),
                  pl.BlockSpec((1, K, N), lambda b, m: (b, 0, 0))],
        out_specs=pl.BlockSpec((1, tmb, N), lambda b, m: (b, m, 0)),
        compiler_params=pltpu.CompilerParams(
            dimension_semantics=("parallel", "parallel")),
    )
    return jax.jit(f)


def pallas_bmm(a, b):
    """(B,M,K) @ (B,K,N) -> (B,M,N) bf16, f32 MXU accumulation."""
    B, M, K = a.shape
    _, _, N = b.shape
    tmb = M if M <= 512 else 256
    Mp = _rup(M, tmb)
    a_p = a.astype(BF16)
    if Mp != M:
        a_p = jnp.pad(a_p, ((0, 0), (0, Mp - M), (0, 0)))
    out = _bmm_fn(B, Mp, K, N, tmb)(a_p, b.astype(BF16))
    if Mp != M:
        out = out[:, :M, :]
    return out


# ---------------------------------------------------------------------------
# Per-batch channel-last reduction / broadcast kernels  (blocks: (1, HW, C))
# ---------------------------------------------------------------------------
def _k_spatial_sum_max(x_ref, sum_ref, max_ref):
    x = x_ref[...].astype(F32)
    sum_ref[...] = jnp.sum(x, axis=1, keepdims=True)
    max_ref[...] = jnp.max(x, axis=1, keepdims=True)


@functools.lru_cache(maxsize=None)
def _spatial_sum_max_fn(B, HW, C):
    f = pl.pallas_call(
        _k_spatial_sum_max,
        out_shape=(jax.ShapeDtypeStruct((B, 1, C), F32),
                   jax.ShapeDtypeStruct((B, 1, C), F32)),
        grid=(B,),
        in_specs=[pl.BlockSpec((1, HW, C), lambda b: (b, 0, 0))],
        out_specs=[pl.BlockSpec((1, 1, C), lambda b: (b, 0, 0)),
                   pl.BlockSpec((1, 1, C), lambda b: (b, 0, 0))],
        compiler_params=pltpu.CompilerParams(dimension_semantics=("parallel",)),
    )
    return jax.jit(f)


def spatial_sum_max(x):
    """x: (B,H,W,C) bf16 -> per-channel spatial sum and max, each (B,C) f32."""
    B, H, W, C = x.shape
    s, m = _spatial_sum_max_fn(B, H * W, C)(x.reshape(B, H * W, C))
    return s.reshape(B, C), m.reshape(B, C)


def _k_ca_apply_pool(x_ref, s_ref, xs_ref, mean_ref, max_ref):
    scale = jax.nn.sigmoid(s_ref[...].astype(F32))          # (1,1,C) channel attention
    x = x_ref[...].astype(F32) * scale                       # lane-broadcast over channels
    xs_ref[...] = x.astype(xs_ref.dtype)
    mean_ref[...] = jnp.mean(x, axis=2, keepdims=True).astype(mean_ref.dtype)
    max_ref[...] = jnp.max(x, axis=2, keepdims=True).astype(max_ref.dtype)


@functools.lru_cache(maxsize=None)
def _ca_apply_pool_fn(B, HW, C):
    f = pl.pallas_call(
        _k_ca_apply_pool,
        out_shape=(jax.ShapeDtypeStruct((B, HW, C), BF16),
                   jax.ShapeDtypeStruct((B, HW, 1), BF16),
                   jax.ShapeDtypeStruct((B, HW, 1), BF16)),
        grid=(B,),
        in_specs=[pl.BlockSpec((1, HW, C), lambda b: (b, 0, 0)),
                  pl.BlockSpec((1, 1, C), lambda b: (b, 0, 0))],
        out_specs=[pl.BlockSpec((1, HW, C), lambda b: (b, 0, 0)),
                   pl.BlockSpec((1, HW, 1), lambda b: (b, 0, 0)),
                   pl.BlockSpec((1, HW, 1), lambda b: (b, 0, 0))],
        compiler_params=pltpu.CompilerParams(dimension_semantics=("parallel",)),
    )
    return jax.jit(f)


def ca_apply_pool(x, logits):
    """Fused sigmoid(channel logits)*x + channel mean/max pooling (channel-last)."""
    B, H, W, C = x.shape
    xs, mean_m, max_m = _ca_apply_pool_fn(B, H * W, C)(
        x.reshape(B, H * W, C), logits.astype(BF16).reshape(B, 1, C))
    return (xs.reshape(B, H, W, C),
            mean_m.reshape(B, H, W, 1), max_m.reshape(B, H, W, 1))


def _k_gru_pool(x_ref, smax_ref, cmax_ref):
    x = x_ref[...]
    smax_ref[...] = jnp.max(x.astype(F32), axis=1, keepdims=True)   # spatial max per channel
    cmax_ref[...] = jnp.max(x, axis=2, keepdims=True).astype(cmax_ref.dtype)  # channel max


@functools.lru_cache(maxsize=None)
def _gru_pool_fn(B, HW, C2):
    f = pl.pallas_call(
        _k_gru_pool,
        out_shape=(jax.ShapeDtypeStruct((B, 1, C2), F32),
                   jax.ShapeDtypeStruct((B, HW, 1), BF16)),
        grid=(B,),
        in_specs=[pl.BlockSpec((1, HW, C2), lambda b: (b, 0, 0))],
        out_specs=[pl.BlockSpec((1, 1, C2), lambda b: (b, 0, 0)),
                   pl.BlockSpec((1, HW, 1), lambda b: (b, 0, 0))],
        compiler_params=pltpu.CompilerParams(dimension_semantics=("parallel",)),
    )
    return jax.jit(f)


def gru_pool(x):
    """Fused spatial-max (channel att input) + channel-max (spatial att input)."""
    B, H, W, C2 = x.shape
    smax, cmax = _gru_pool_fn(B, H * W, C2)(x.reshape(B, H * W, C2))
    return smax.reshape(B, C2), cmax.reshape(B, H, W, 1)


def _k_chan_scale(x_ref, s_ref, o_ref):
    o_ref[...] = x_ref[...] * s_ref[...]        # (1,HW,C) * (1,1,C)


@functools.lru_cache(maxsize=None)
def _chan_scale_fn(B, HW, C):
    f = pl.pallas_call(
        _k_chan_scale,
        out_shape=jax.ShapeDtypeStruct((B, HW, C), BF16),
        grid=(B,),
        in_specs=[pl.BlockSpec((1, HW, C), lambda b: (b, 0, 0)),
                  pl.BlockSpec((1, 1, C), lambda b: (b, 0, 0))],
        out_specs=pl.BlockSpec((1, HW, C), lambda b: (b, 0, 0)),
        compiler_params=pltpu.CompilerParams(dimension_semantics=("parallel",)),
    )
    return jax.jit(f)


def chan_scale(x, s):
    """x (B,H,W,C) * s (B,C), broadcast over spatial positions."""
    B, H, W, C = x.shape
    out = _chan_scale_fn(B, H * W, C)(x.reshape(B, H * W, C),
                                      s.astype(BF16).reshape(B, 1, C))
    return out.reshape(B, H, W, C)


def _k_mul_rowsum(a_ref, b_ref, o_ref):
    o_ref[...] = jnp.sum(a_ref[...].astype(F32) * b_ref[...].astype(F32),
                         axis=1, keepdims=True)


@functools.lru_cache(maxsize=None)
def _mul_rowsum_fn(B, HW, C):
    f = pl.pallas_call(
        _k_mul_rowsum,
        out_shape=jax.ShapeDtypeStruct((B, 1, C), F32),
        grid=(B,),
        in_specs=[pl.BlockSpec((1, HW, C), lambda b: (b, 0, 0)),
                  pl.BlockSpec((1, HW, C), lambda b: (b, 0, 0))],
        out_specs=pl.BlockSpec((1, 1, C), lambda b: (b, 0, 0)),
        compiler_params=pltpu.CompilerParams(dimension_semantics=("parallel",)),
    )
    return jax.jit(f)


def mul_rowsum(a, b):
    """Per-(b,c) spatial dot product (depth correlation)."""
    B, H, W, C = a.shape
    out = _mul_rowsum_fn(B, H * W, C)(a.reshape(B, H * W, C),
                                      b.reshape(B, H * W, C))
    return out.reshape(B, C)


# ---------------------------------------------------------------------------
# Row-tiled broadcast kernels over flattened (R, C) channel-last activations.
# ---------------------------------------------------------------------------
def _row_tile(R):
    if R <= 512:
        return R, R
    for t in (512, 256, 128, 64, 32, 16, 8):
        if R % t == 0:
            return t, R
    return 256, _rup(R, 256)


def _k_row_mul(x_ref, a_ref, o_ref):
    o_ref[...] = x_ref[...] * a_ref[...]


def _k_row_enhance(x_ref, a_ref, o_ref):
    o_ref[...] = (x_ref[...].astype(F32) * (a_ref[...].astype(F32) + 1.0)).astype(o_ref.dtype)


def _k_gru_update(z_ref, h_ref, c_ref, o_ref):
    z = z_ref[...].astype(F32)
    o_ref[...] = (z * h_ref[...].astype(F32)
                  + (1.0 - z) * jnp.tanh(c_ref[...].astype(F32))).astype(o_ref.dtype)


@functools.lru_cache(maxsize=None)
def _row_kernel_fn(kernel, Rp, C, tr, widths):
    f = pl.pallas_call(
        kernel,
        out_shape=jax.ShapeDtypeStruct((Rp, C), BF16),
        grid=(Rp // tr,),
        in_specs=[pl.BlockSpec((tr, w), lambda i: (i, 0)) for w in widths],
        out_specs=pl.BlockSpec((tr, C), lambda i: (i, 0)),
        compiler_params=pltpu.CompilerParams(dimension_semantics=("parallel",)),
    )
    return jax.jit(f)


def _row_call(kernel, widths, arrays, out_shape4):
    B, H, W, C = out_shape4
    R = B * H * W
    tr, Rp = _row_tile(R)
    flats = []
    for arr, w in zip(arrays, widths):
        f = arr.reshape(R, w)
        if f.dtype != BF16:
            f = f.astype(BF16)
        if Rp != R:
            f = jnp.pad(f, ((0, Rp - R), (0, 0)))
        flats.append(f)
    out = _row_kernel_fn(kernel, Rp, C, tr, widths)(*flats)
    if Rp != R:
        out = out[:R]
    return out.reshape(B, H, W, C)


def row_mul(x, a):
    """x (B,H,W,C) * a (B,H,W,1): per-pixel scale broadcast over channels."""
    return _row_call(_k_row_mul, (x.shape[-1], 1), (x, a), x.shape)


def spatial_enhance(x, a):
    """x * (1 + a): attention enhancement."""
    return _row_call(_k_row_enhance, (x.shape[-1], 1), (x, a), x.shape)


def gru_update(z, h, c):
    """h_next = z*h + (1-z)*tanh(c), z per-pixel broadcast over channels."""
    return _row_call(_k_gru_update, (1, h.shape[-1], h.shape[-1]), (z, h, c), h.shape)


# ---------------------------------------------------------------------------
# Generic lane-dense element-wise kernels (flattened, bf16 in/out)
# ---------------------------------------------------------------------------
def _k_sigmoid(x_ref, o_ref):
    o_ref[...] = jax.nn.sigmoid(x_ref[...].astype(F32)).astype(o_ref.dtype)


def _k_add(a_ref, b_ref, o_ref):
    o_ref[...] = a_ref[...] + b_ref[...]


@functools.lru_cache(maxsize=None)
def _ew_fn(kernel, Rp, L, tr, n_in):
    f = pl.pallas_call(
        kernel,
        out_shape=jax.ShapeDtypeStruct((Rp, L), BF16),
        grid=(Rp // tr,),
        in_specs=[pl.BlockSpec((tr, L), lambda i: (i, 0)) for _ in range(n_in)],
        out_specs=pl.BlockSpec((tr, L), lambda i: (i, 0)),
        compiler_params=pltpu.CompilerParams(dimension_semantics=("parallel",)),
    )
    return jax.jit(f)


def _ew_apply(kernel, *arrays):
    shape = arrays[0].shape
    n = arrays[0].size
    L = 512 if n % 512 == 0 else 128
    R = _rup(n, L) // L
    tr, Rp = _row_tile(R)
    npad = Rp * L
    flat = [jnp.pad(a.astype(BF16).reshape(-1), (0, npad - n)).reshape(Rp, L)
            for a in arrays]
    out = _ew_fn(kernel, Rp, L, tr, len(arrays))(*flat)
    return out.reshape(-1)[:n].reshape(shape)


def pallas_sigmoid(x):
    return _ew_apply(_k_sigmoid, x)


def ew_add(a, b):
    return _ew_apply(_k_add, a, b)


# ---------------------------------------------------------------------------
# Convolution (channel-last im2col + Pallas fused matmul) and upsampling
# ---------------------------------------------------------------------------
def conv2d(x, cv, stride=1, padding=0, act="none"):
    """x: (B, H, W, Cin) bf16 channel-last; cv: prepared weight dict."""
    B, H, W, Cin = x.shape
    k, cout = cv["k"], cv["cout"]
    assert Cin == cv["cin"], (Cin, cv["cin"])
    if padding:
        xp = jnp.pad(x, ((0, 0), (padding, padding), (padding, padding), (0, 0)))
    else:
        xp = x
    Ho = (H + 2 * padding - k) // stride + 1
    Wo = (W + 2 * padding - k) // stride + 1
    if k == 1 and stride == 1:
        A = x.reshape(B * Ho * Wo, Cin)
    else:
        # TODO(synk): k>1 patches still materialize the k*k-expanded bf16 tensor in HBM
        # once; an in-kernel halo gather (Element index maps / manual DMA) would remove it.
        cols = []
        for i in range(k):
            for j in range(k):
                cols.append(xp[:, i:i + stride * (Ho - 1) + 1:stride,
                               j:j + stride * (Wo - 1) + 1:stride, :])
        A = jnp.stack(cols, axis=3).reshape(B * Ho * Wo, k * k * Cin)
    out = pallas_matmul(A, cv["wm"], cv["b"], act)
    return out.reshape(B, Ho, Wo, cout)


def upsample_bilinear(x, scale):
    """nn.Upsample(scale_factor=scale, mode='bilinear', align_corners=True), channel-last."""
    B, H, W, C = x.shape

    def mat(n_in, n_out):
        if n_in == 1:
            return jnp.ones((n_out, 1), F32)
        src = jnp.arange(n_out, dtype=F32) * (n_in - 1) / (n_out - 1)
        i0 = jnp.clip(jnp.floor(src).astype(jnp.int32), 0, n_in - 1)
        i1 = jnp.clip(i0 + 1, 0, n_in - 1)
        w1 = src - i0.astype(F32)
        return ((1.0 - w1)[:, None] * jax.nn.one_hot(i0, n_in, dtype=F32)
                + w1[:, None] * jax.nn.one_hot(i1, n_in, dtype=F32))

    Mh, Mw = mat(H, H * scale), mat(W, W * scale)
    y = jnp.einsum("oh,bhwc->bowc", Mh, x.astype(F32))
    y = jnp.einsum("pw,bowc->bopc", Mw, y)
    return y.astype(BF16)


# ---------------------------------------------------------------------------
# AGRFNet sub-modules (channel-last)
# ---------------------------------------------------------------------------
def attend_T(x, ca, sa_cv, t_cv):
    """CBAM channel attention -> CBAM spatial attention -> 3x3 conv + ReLU ("T" layer)."""
    B, H, W, C = x.shape
    HW = H * W
    ssum, smax = spatial_sum_max(x)                                # (B,C) f32
    pooled = jnp.concatenate([ssum / float(HW), smax], axis=0)     # avg | max, one matmul
    h1 = pallas_matmul(pooled, ca[0], act="relu")
    out = pallas_matmul(h1, ca[1])
    logits = out[:B] + out[B:]                                     # shared-MLP sum
    xs, mean_m, max_m = ca_apply_pool(x, logits)                   # fused scale + pooling
    sa_in = jnp.concatenate([mean_m, max_m], axis=-1)              # (B,H,W,2): [avg, max]
    att = conv2d(sa_in, sa_cv, stride=1, padding=3, act="sigmoid") # (B,H,W,1)
    x2 = row_mul(xs, att)
    return conv2d(x2, t_cv, stride=1, padding=1, act="relu")


def gru_cell(gp, inp, h_cur):
    # TODO(synk): Conv2dGRUCell.in_conv is defined but unused in the reference forward; omitted.
    combined = jnp.concatenate([inp, h_cur], axis=-1)              # (B,H,W,2C)
    smax, cmax = gru_pool(combined)                                # fused reductions
    r = pallas_matmul(pallas_matmul(smax, gp["ca_w1"], act="relu"),
                      gp["ca_w2"], act="sigmoid")                  # (B, C)
    z = conv2d(cmax, gp["sa_cv"], stride=1, padding=3, act="sigmoid")   # (B,H,W,1)
    h_bar = chan_scale(h_cur, r)
    cc_h = conv2d(jnp.concatenate([inp, h_bar], axis=-1),
                  gp["out_cv"], stride=1, padding=1)
    return gru_update(z, h_cur, cc_h)


def pixel_attention(pp, depth, rgb):
    B, H, W, C = depth.shape
    HW = H * W
    h_c = jnp.concatenate([rgb, depth], axis=-1)
    h_c_conv = conv2d(h_c, pp["hc"], 1, 1, act="relu")

    # pixel correlation: corr[b, q, p] = sum_c rgb[b,q,c] * depth[b,p,c]  (batched MXU matmul)
    corr = pallas_bmm(rgb.reshape(B, HW, C),
                      jnp.swapaxes(depth.reshape(B, HW, C), 1, 2))
    corr = corr.reshape(B, H, W, HW)

    # spatial_pool_agr (BN scale folded into conv weights; ReLU/sigmoid fused in matmul)
    s = conv2d(corr, pp["sp0"], 1, 0, act="relu")
    s = conv2d(s, pp["sp1"], 1, 0, act="relu")
    s = conv2d(s, pp["spt0"], 1, 2, act="relu")     # ConvTranspose2d(k=3,s=1) == conv pad=2
    spatial_att = conv2d(s, pp["spt1"], 1, 2, act="sigmoid")

    # depth correlation -> channel attention (MaxPool2d(1)/AvgPool2d(1) are identities;
    # the x2 of the two identical MLP branches is folded into cp_w1 at init).
    dc = mul_rowsum(rgb, depth)                     # (B, C) f32
    channel_att = pallas_matmul(
        pallas_matmul(dc, pp["cp_w0"], pp["cp_b0"], act="relu"),
        pp["cp_w1"], pp["cp_b1"], act="sigmoid")    # (B, C)

    hc_ch = chan_scale(h_c_conv, channel_att)
    hc_sp = row_mul(h_c_conv, spatial_att)
    h_att = jnp.concatenate([hc_sp, hc_ch], axis=-1)
    return conv2d(h_att, pp["hf"], 1, 1, act="relu")


# ---------------------------------------------------------------------------
# Parameters (conv weights pre-transformed once to bf16 matmul layout)
# ---------------------------------------------------------------------------
def init_params(key):
    keys = iter(jax.random.split(key, 256))

    def nxt():
        return next(keys)

    _BN_SCALE = 1.0 / (1.0 + 1e-5) ** 0.5
    # TODO(synk): BatchNorm2d folded in eval mode with default running stats
    # (mean=0, var=1, gamma=1, beta=0); training-mode batch statistics are not modeled.

    def make_conv(cout, cin, k, bias=True, scale=1.0):
        fan = cin * k * k
        w = jax.random.normal(nxt(), (cout, cin, k, k), F32) * (1.0 / fan) ** 0.5
        wm = (w.transpose(2, 3, 1, 0).reshape(k * k * cin, cout) * scale).astype(BF16)
        return {"wm": wm,
                "b": (jnp.zeros((cout,), F32) if bias else None),
                "k": k, "cin": cin, "cout": cout}

    def lin_w(i, o):                               # stored already transposed (in, out), bf16
        return (jax.random.normal(nxt(), (i, o), F32) * (1.0 / i) ** 0.5).astype(BF16)

    zeros = lambda n: jnp.zeros((n,), F32)

    p = {}
    # TODO(synk): the ResNet50 backbone definition is not part of the provided module;
    # replaced by a deterministic 5-stage conv stub with matching channel counts / strides.
    bb_cfg = [(64, 3, 4), (256, 64, 1), (512, 256, 2), (1024, 512, 2), (2048, 1024, 2)]
    for name in ("rgb", "depth"):
        p["bb_" + name] = [(make_conv(co, ci, 3), s) for (co, ci, s) in bb_cfg]
    chans = [64, 256, 512, 1024, 2048]
    for name in ("rgb", "depth"):
        p["ca_" + name] = [(lin_w(c, c // 16), lin_w(c // 16, c)) for c in chans]
        p["sa_" + name] = [make_conv(1, 2, 7, bias=False) for _ in chans]
        p["T_" + name] = [make_conv(64, c, 3) for c in chans]
    for g in ("gru1", "gru2"):
        p[g] = dict(out_cv=make_conv(64, 128, 3),
                    ca_w1=lin_w(128, 8), ca_w2=lin_w(8, 64),
                    sa_cv=make_conv(1, 1, 7, bias=False))
    hw8 = 64  # (H/8)*(W/8) for the 64x64 test input (1936 in the 352x352 original model)
    p["pa"] = dict(
        hc=make_conv(64, 128, 3), hf=make_conv(64, 128, 3),
        sp0=make_conv(32, hw8, 3, scale=_BN_SCALE),
        sp1=make_conv(32, 32, 3, scale=_BN_SCALE),
        # TODO(synk): ConvTranspose2d(k=3, stride=1) modeled as a pad=2 conv (weights random).
        spt0=make_conv(32, 32, 3, scale=_BN_SCALE),
        spt1=make_conv(1, 32, 3),
        cp_w0=lin_w(64, 16), cp_b0=zeros(16),
        cp_w1=lin_w(16, 64) * 2.0, cp_b1=zeros(64))   # x2: avg+max branches identical
    p["fuse0"] = make_conv(384, 704, 3)
    p["fuse1"] = make_conv(64, 384, 3)
    p["pred0"] = make_conv(32, 64, 3)
    p["pred1"] = make_conv(1, 32, 3)
    p["hl0"] = make_conv(32, 64, 3)
    p["hl1"] = make_conv(1, 32, 3)
    return p


# ---------------------------------------------------------------------------
# AGRFNet forward (activations are channel-last bf16 internally)
# ---------------------------------------------------------------------------
def agrfnet_forward(params, x_rgb, x_depth):
    xr = x_rgb.transpose(0, 2, 3, 1).astype(BF16)
    xd = x_depth.transpose(0, 2, 3, 1).astype(BF16)

    def backbone(x, layers):
        feats = []
        for (cv, s) in layers:
            x = conv2d(x, cv, stride=s, padding=1, act="relu")
            feats.append(x)
        return feats

    fr = backbone(xr, params["bb_rgb"])
    fd = backbone(xd, params["bb_depth"])

    def stream(feats, name):
        return [attend_T(feats[i], params["ca_" + name][i],
                         params["sa_" + name][i], params["T_" + name][i])
                for i in range(5)]

    r = stream(fr, "rgb")
    d = stream(fd, "depth")

    x_rgb_0, x_rgb_1, x_rgb_2_1 = r[0], r[1], r[2]
    x_rgb_2_0 = upsample_bilinear(x_rgb_2_1, 2)
    x_rgb_3_1 = upsample_bilinear(r[3], 2)
    x_rgb_4_1 = upsample_bilinear(r[4], 4)
    x_depth_0, x_depth_1, x_depth_2_1 = d[0], d[1], d[2]
    x_depth_2_0 = upsample_bilinear(x_depth_2_1, 2)
    x_depth_3_1 = upsample_bilinear(d[3], 2)
    x_depth_4_1 = upsample_bilinear(d[4], 4)

    h_s = pixel_attention(params["pa"], x_depth_4_1, x_rgb_4_1)

    g1 = params["gru1"]
    h4_1 = gru_cell(g1, x_depth_4_1, h_s)
    h4 = gru_cell(g1, x_rgb_4_1, h4_1)
    h3_1 = gru_cell(g1, x_depth_3_1, h4)
    h3 = gru_cell(g1, x_rgb_3_1, h3_1)
    h2_1 = gru_cell(g1, x_depth_2_1, h3)
    h2_1 = gru_cell(g1, x_rgb_2_1, h2_1)
    h2_1 = upsample_bilinear(h2_1, 2)

    h = conv2d(h2_1, params["hl0"], 1, 1, act="relu")
    h = conv2d(h, params["hl1"], 1, 1)
    attention = pallas_sigmoid(h)

    x_rgb_2_0 = spatial_enhance(x_rgb_2_0, attention)
    x_depth_2_0 = spatial_enhance(x_depth_2_0, attention)
    x_rgb_1 = spatial_enhance(x_rgb_1, attention)
    x_depth_1 = spatial_enhance(x_depth_1, attention)
    x_rgb_0 = spatial_enhance(x_rgb_0, attention)
    x_depth_0 = spatial_enhance(x_depth_0, attention)

    g2 = params["gru2"]
    h2_0 = gru_cell(g2, x_depth_2_0, h2_1)
    h2 = gru_cell(g2, x_rgb_2_0, h2_0)
    h1_0 = gru_cell(g2, x_depth_1, h2)
    h1 = gru_cell(g2, x_rgb_1, h1_0)
    h0_0 = gru_cell(g2, x_depth_0, h1)
    h0 = gru_cell(g2, x_rgb_0, h0_0)

    x_rgb_3_1 = upsample_bilinear(x_rgb_3_1, 2)
    x_depth_3_1 = upsample_bilinear(x_depth_3_1, 2)
    x_rgb_4_1 = upsample_bilinear(x_rgb_4_1, 2)
    x_depth_4_1 = upsample_bilinear(x_depth_4_1, 2)

    ca_r = jnp.concatenate([x_rgb_0, x_rgb_1, x_rgb_2_0, x_rgb_3_1, x_rgb_4_1], axis=-1)
    ca_d = jnp.concatenate([x_depth_0, x_depth_1, x_depth_2_0, x_depth_3_1, x_depth_4_1], axis=-1)
    z = jnp.concatenate([h0, ca_r, ca_d], axis=-1)                 # (B, H/4, W/4, 704)

    y = conv2d(z, params["fuse0"], 1, 1, act="relu")
    y = upsample_bilinear(y, 2)
    y = conv2d(y, params["fuse1"], 1, 1, act="relu")
    y = ew_add(y, upsample_bilinear(h0, 2))
    y = conv2d(y, params["pred0"], 1, 1, act="relu")
    y = upsample_bilinear(y, 2)
    y = conv2d(y, params["pred1"], 1, 1)

    y_nchw = y.transpose(0, 3, 1, 2).astype(F32)
    h_up = upsample_bilinear(h, 4).transpose(0, 3, 1, 2).astype(F32)
    return y_nchw, h_up


# ---------------------------------------------------------------------------
if __name__ == "__main__":
    key = jax.random.PRNGKey(0)
    pkey, xkey, dkey = jax.random.split(key, 3)
    params = init_params(pkey)

    B, H, W = 2, 64, 64
    x_rgb = jax.random.normal(xkey, (B, 3, H, W), F32)
    x_depth = jax.random.normal(dkey, (B, 3, H, W), F32)

    y, h_up = agrfnet_forward(params, x_rgb, x_depth)
    jax.block_until_ready((y, h_up))

    assert y.shape == (B, 1, H, W), y.shape
    assert h_up.shape == (B, 1, H, W), h_up.shape
    assert bool(jnp.all(jnp.isfinite(y))) and bool(jnp.all(jnp.isfinite(h_up)))
    print("KERNEL_OK")
</pallas_src>

<mosaic_0001>
module attributes {stable_mosaic.version = 11 : i64} {
  func.func @_mm_kernel_single(%arg0: i32, %arg1: i32, %arg2: memref<512x128xbf16, #tpu.memory_space<vmem>>, %arg3: memref<128x128xbf16, #tpu.memory_space<vmem>>, %arg4: memref<1x128xf32, #tpu.memory_space<vmem>>, %arg5: memref<512x128xbf16, #tpu.memory_space<vmem>>) attributes {dimension_semantics = [#tpu.dimension_semantics<parallel>, #tpu.dimension_semantics<parallel>], iteration_bounds = array<i64: 1, 1>, scalar_prefetch = 0 : i64, scratch_operands = 0 : i64, tpu.core_type = #tpu.core_type<tc>, window_params = [{transform_indices = @transform_0, window_bounds = array<i64: 512, 128>}, {transform_indices = @transform_1, window_bounds = array<i64: 128, 128>}, {transform_indices = @transform_2, window_bounds = array<i64: 1, 128>}, {transform_indices = @transform_3, window_bounds = array<i64: 512, 128>}]} {
    %c0 = arith.constant 0 : index
    %c0_0 = arith.constant 0 : index
    %0 = vector.load %arg2[%c0, %c0_0] : memref<512x128xbf16, #tpu.memory_space<vmem>>, vector<512x128xbf16>
    %c0_1 = arith.constant 0 : index
    %c0_2 = arith.constant 0 : index
    %1 = vector.load %arg3[%c0_1, %c0_2] : memref<128x128xbf16, #tpu.memory_space<vmem>>, vector<128x128xbf16>
    %cst = arith.constant dense<0.000000e+00> : vector<512x128xf32>
    %2 = tpu.matmul %0, %1, %cst {dimension_numbers = #tpu.dot_dimension_numbers<[1], [0], [0], [1], [0, 0, 1, 1], [], []>} : vector<512x128xbf16>, vector<128x128xbf16>, vector<512x128xf32> -> vector<512x128xf32>
    %c0_3 = arith.constant 0 : index
    %c0_4 = arith.constant 0 : index
    %3 = vector.load %arg4[%c0_3, %c0_4] : memref<1x128xf32, #tpu.memory_space<vmem>>, vector<1x128xf32>
    %4 = vector.broadcast %3 : vector<1x128xf32> to vector<512x128xf32>
    %5 = arith.addf %2, %4 : vector<512x128xf32>
    %cst_5 = arith.constant 0.000000e+00 : f32
    %6 = vector.broadcast %cst_5 : f32 to vector<512x128xf32>
    %7 = arith.maximumf %5, %6 : vector<512x128xf32>
    %8 = arith.truncf %7 : vector<512x128xf32> to vector<512x128xbf16>
    %c0_6 = arith.constant 0 : index
    %c0_7 = arith.constant 0 : index
    %9 = vector.load %arg5[%c0_6, %c0_7] : memref<512x128xbf16, #tpu.memory_space<vmem>>, vector<512x128xbf16>
    tpu.vector_store %arg5[%c0_6, %c0_7], %8 {strides = array<i32>} : memref<512x128xbf16, #tpu.memory_space<vmem>>, vector<512x128xbf16>,
    return
  }
  func.func @transform_0(%arg0: i32, %arg1: i32) -> (i32, i32) {
    %c0_i32 = arith.constant 0 : i32
    %c0_i32_0 = arith.constant 0 : i32
    return %arg0, %c0_i32 : i32, i32
  }
  func.func @transform_1(%arg0: i32, %arg1: i32) -> (i32, i32) {
    %c0_i32 = arith.constant 0 : i32
    %c0_i32_0 = arith.constant 0 : i32
    return %c0_i32, %arg1 : i32, i32
  }
  func.func @transform_2(%arg0: i32, %arg1: i32) -> (i32, i32) {
    %c0_i32 = arith.constant 0 : i32
    %c0_i32_0 = arith.constant 0 : i32
    return %c0_i32, %arg1 : i32, i32
  }
  func.func @transform_3(%arg0: i32, %arg1: i32) -> (i32, i32) {
    %c0_i32 = arith.constant 0 : i32
    return %arg0, %arg1 : i32, i32
  }
}

</mosaic_0001>

<bundles_post_ra>
// kernel: tpu_custom_call.1
= control target key start
LH: loop header
LB: loop body
LE: loop exit
PB: predicated region body
PF: predicated region fallthrough
CT: control target
= control target key end

     0   :  { %8 = vsyncpa [#allocation3], 0  ;;  %s1814_s0 = inlined_call_operand.hbm [shape: bf16[512,128], index: 0, kind: input, shape index: {}]   ;;  %s1815_s1 = inlined_call_operand.hbm [shape: bf16[128,128], index: 1, kind: input, shape index: {}]   ;;  %s1816_s2 = inlined_call_operand.vmem [shape: f32[1,128], index: 2, kind: input, shape index: {}]   ;;  %s1817_s3 = inlined_call_operand.hbm [shape: bf16[512,128], index: 3, kind: output, shape index: {}]  }
   0x1   :  { %9 = vsyncpa [#allocation6], 0 }
   0x2   :  { %10 = vsyncpa [#allocation4], 0  ;;  %s1675_s12 = smov [#allocation2]   ;;  %s1603_s16 = scalar_lea.hbm %s1814_s0, 4096 }
   0x3   :  { %s16_s13 = sshll.u32 %s1675_s12, 4  ;;  %p1604_p0 = scmp.ne.s32.totalorder %s1814_s0, %s1603_s16  ;;  %s17_s13 = int_to_ptr.vmem [resolvable:$true] %s16_s13 }
   0x4   :  { %p1607_p1 = scmp.lt.u32.totalorder %s1603_s16, %s1814_s0 }
   0x6   :  { %p1609_p2 = pnand %p1607_p1, %p1604_p0 }
   0x8   :  { %1612 = shalt.err (!%p1609_p2)
}
   0x9   :  { %s1613_s21 = scalar_lea.vmem %s17_s13, 4096  ;;  %p1618_p4 = scmp.lt.s32.totalorder %s17_s13, %s17_s13 }
   0xa   :  { %p1614_p3 = scmp.ne.s32.totalorder %s17_s13, %s1613_s21  ;;  %p1619_p5 = scmp.lt.s32.totalorder %s1613_s21, %s1613_s21 }
   0xc   :  { %p1620_p6 = por %p1619_p5, %p1618_p4 }
   0xe   :  { %p1621_p7 = pnand %p1620_p6, %p1614_p3 }
  0x10   :  { %1624 = shalt.err (!%p1621_p7)
}
  0x11   :  { %s1676_s22 = smov 64   ;;  %s1677_s23 = smov 4  }
  0x12   :  { %22 = dma.hbm_to_vmem [thread:$0]  %s1814_s0, 4096, %s17_s13, [#allocation3], %s1676_s22, %s1676_s22, %s1677_s23  }
  0x13   :  { %s1678_s26 = smov [#allocation5]   ;;  %s1625_s30 = scalar_lea.hbm %s1815_s1, 1024 }
  0x14   :  { %s28_s27 = sshll.u32 %s1678_s26, 4  ;;  %p1626_p8 = scmp.ne.s32.totalorder %s1815_s1, %s1625_s30  ;;  %s29_s27 = int_to_ptr.vmem [resolvable:$true] %s28_s27 }
  0x15   :  { %p1629_p9 = scmp.lt.u32.totalorder %s1625_s30, %s1815_s1 }
  0x17   :  { %p1631_p10 = pnand %p1629_p9, %p1626_p8 }
  0x19   :  { %1634 = shalt.err (!%p1631_p10)
}
  0x1a   :  { %s1635_s8 = scalar_lea.vmem %s29_s27, 1024  ;;  %p1640_p12 = scmp.lt.s32.totalorder %s29_s27, %s29_s27 }
  0x1b   :  { %p1636_p11 = scmp.ne.s32.totalorder %s29_s27, %s1635_s8  ;;  %p1641_p13 = scmp.lt.s32.totalorder %s1635_s8, %s1635_s8 }
  0x1d   :  { %p1642_p0 = por %p1641_p13, %p1640_p12 }
  0x1f   :  { %p1643_p1 = pnand %p1642_p0, %p1636_p11 }
  0x21   :  { %1646 = shalt.err (!%p1643_p1)
}
  0x22   :  { %34 = dma.hbm_to_vmem [thread:$0]  %s1815_s1, 1024, %s29_s27, [#allocation6], %s1676_s22, %s1676_s22, %s1677_s23  }
  0x23   :  { %1669 = dma.done.wait [#allocation3], 4096  }
  0x24   :  { %1670 = vsyncadd [#allocation3], 4294963200 }
  0x25   :  { %1671 = dma.done.wait [#allocation6], 1024  }
  0x26   :  { %1672 = vsyncadd [#allocation6], 4294966272  ;;  %v1563_v0 = vld [vmem:[#allocation5] sm:$0xff]   ;;  %v1564_v1 = vld [vmem:[#allocation5 + $0x8] sm:$0xff]  }
  0x27   :  { %1462 = vmatprep.subr.bf16.mxu0 %v1563_v0  ;;  %1542 = vmatprep.subr.bf16.mxu1 %v1563_v0  ;;  %v1565_v2 = vld [vmem:[#allocation5 + $0x10] sm:$0xff]   ;;  %v1566_v3 = vld [vmem:[#allocation5 + $0x18] sm:$0xff]   ;;  %v1571_v4 = vld [vmem:[#allocation2] sm:$0xff]  }
  0x28   :  { %1463 = vmatpush3.bf16.msra.mxu0 %v1563_v0  ;;  %1550 = vmatpush3.bf16.msra.mxu1 %v1563_v0  ;;  %v1572_v5 = vld [vmem:[#allocation2 + $0x80] sm:$0xff]   ;;  %v1568_v7 = vld [vmem:[#allocation5 + $0x28] sm:$0xff]   ;;  %v1569_v8 = vld [vmem:[#allocation5 + $0x30] sm:$0xff]  }
  0x29   :  { %1464 = vmatprep.subr.bf16.mxu0 %v1564_v1  ;;  %1543 = vmatprep.subr.bf16.mxu1 %v1564_v1  ;;  %v1567_v6 = vld [vmem:[#allocation5 + $0x20] sm:$0xff]   ;;  %v1570_v9 = vld [vmem:[#allocation5 + $0x38] sm:$0xff]   ;;  %v1573_v10 = vld [vmem:[#allocation2 + $0x8] sm:$0xff]  }
  0x2a   :  { %1478 = vmatprep.mubr.bf16.mxu0 %v1571_v4  ;;  %1510 = vmatprep.mubr.bf16.mxu1 %v1572_v5  ;;  %v1574_v11 = vld [vmem:[#allocation2 + $0x88] sm:$0xff]   ;;  %v1575_v12 = vld [vmem:[#allocation2 + $0x10] sm:$0xff]   ;;  %v1577_v14 = vld [vmem:[#allocation2 + $0x18] sm:$0xff]  }
  0x2b   :  { %v1576_v13 = vld [vmem:[#allocation2 + $0x90] sm:$0xff]   ;;  %v1578_v15 = vld [vmem:[#allocation2 + $0x98] sm:$0xff]   ;;  %v1579_v16 = vld [vmem:[#allocation2 + $0x20] sm:$0xff]  }
  0x2c   :  { %1465 = vmatpush3.bf16.msra.mxu0 %v1564_v1  ;;  %1551 = vmatpush3.bf16.msra.mxu1 %v1564_v1  ;;  %v1580_v17 = vld [vmem:[#allocation2 + $0xa0] sm:$0xff]   ;;  %v1581_v18 = vld [vmem:[#allocation2 + $0x28] sm:$0xff]   ;;  %v1583_v20 = vld [vmem:[#allocation2 + $0x30] sm:$0xff]  }
  0x2d   :  { %1466 = vmatprep.subr.bf16.mxu0 %v1565_v2  ;;  %1544 = vmatprep.subr.bf16.mxu1 %v1565_v2  ;;  %v1582_v19 = vld [vmem:[#allocation2 + $0xa8] sm:$0xff]   ;;  %v1584_v21 = vld [vmem:[#allocation2 + $0xb0] sm:$0xff]   ;;  %v1585_v22 = vld [vmem:[#allocation2 + $0x38] sm:$0xff]  }
  0x2e   :  { %v1586_v23 = vld [vmem:[#allocation2 + $0xb8] sm:$0xff]   ;;  %v1587_v24 = vld [vmem:[#allocation2 + $0x40] sm:$0xff]   ;;  %v1589_v26 = vld [vmem:[#allocation2 + $0x48] sm:$0xff]  }
  0x2f   :  { %v1588_v25 = vld [vmem:[#allocation2 + $0xc0] sm:$0xff]   ;;  %v1590_v27 = vld [vmem:[#allocation2 + $0xc8] sm:$0xff]   ;;  %v1591_v28 = vld [vmem:[#allocation2 + $0x50] sm:$0xff]  }
  0x30   :  { %1467 = vmatpush3.bf16.msra.mxu0 %v1565_v2  ;;  %1552 = vmatpush3.bf16.msra.mxu1 %v1565_v2  ;;  %v1592_v29 = vld [vmem:[#allocation2 + $0xd0] sm:$0xff]   ;;  %v1593_v30 = vld [vmem:[#allocation2 + $0x58] sm:$0xff]   ;;  %v1595_v32 = vld [vmem:[#allocation2 + $0x60] sm:$0xff]  }
  0x31   :  { %1468 = vmatprep.subr.bf16.mxu0 %v1566_v3  ;;  %1545 = vmatprep.subr.bf16.mxu1 %v1566_v3  ;;  %v1594_v31 = vld [vmem:[#allocation2 + $0xd8] sm:$0xff]   ;;  %v1596_v33 = vld [vmem:[#allocation2 + $0xe0] sm:$0xff]   ;;  %v1597_v34 = vld [vmem:[#allocation2 + $0x68] sm:$0xff]  }
  0x32   :  { %v1598_v35 = vld [vmem:[#allocation2 + $0xe8] sm:$0xff]   ;;  %v1599_v36 = vld [vmem:[#allocation2 + $0x70] sm:$0xff]   ;;  %v1601_v38 = vld [vmem:[#allocation2 + $0x78] sm:$0xff]  }
  0x33   :  { %v1600_v37 = vld [vmem:[#allocation2 + $0xf0] sm:$0xff]   ;;  %v1602_v39 = vld [vmem:[#allocation2 + $0xf8] sm:$0xff]   ;;  %v1733_v40 = vld [vmem:[%s1816_s2] ss:$0 sm:$0xff]  ;;  %s1679_s2 = smov [#allocation7]  }
  0x34   :  { %1469 = vmatpush3.bf16.msra.mxu0 %v1566_v3  ;;  %1553 = vmatpush3.bf16.msra.mxu1 %v1566_v3  ;;  %s1049_s11 = sshll.u32 %s1679_s2, 4  ;;  %s1050_s11 = int_to_ptr.vmem [resolvable:$true] %s1049_s11 }
  0x35   :  { %1470 = vmatprep.subr.bf16.mxu0 %v1567_v6  ;;  %1546 = vmatprep.subr.bf16.mxu1 %v1567_v6  ;;  %s1647_s12 = scalar_lea.vmem %s1050_s11, 4096  ;;  %p1652_p3 = scmp.lt.s32.totalorder %s1050_s11, %s1050_s11 }
  0x36   :  { %p1648_p2 = scmp.ne.s32.totalorder %s1050_s11, %s1647_s12  ;;  %p1653_p4 = scmp.lt.s32.totalorder %s1647_s12, %s1647_s12 }
  0x38   :  { %1471 = vmatpush3.bf16.msra.mxu0 %v1567_v6  ;;  %1554 = vmatpush3.bf16.msra.mxu1 %v1567_v6  ;;  %p1654_p5 = por %p1653_p4, %p1652_p3 }
  0x39   :  { %1472 = vmatprep.subr.bf16.mxu0 %v1568_v7  ;;  %1547 = vmatprep.subr.bf16.mxu1 %v1568_v7 }
  0x3a   :  { %p1655_p6 = pnand %p1654_p5, %p1648_p2 }
  0x3c   :  { %1473 = vmatpush3.bf16.msra.mxu0 %v1568_v7  ;;  %1555 = vmatpush3.bf16.msra.mxu1 %v1568_v7 }
  0x3d   :  { %1474 = vmatprep.subr.bf16.mxu0 %v1569_v8  ;;  %1548 = vmatprep.subr.bf16.mxu1 %v1569_v8 }
  0x40   :  { %1475 = vmatpush3.bf16.msra.mxu0 %v1569_v8  ;;  %1556 = vmatpush3.bf16.msra.mxu1 %v1569_v8 }
  0x41   :  { %1476 = vmatprep.subr.bf16.mxu0 %v1570_v9  ;;  %1549 = vmatprep.subr.bf16.mxu1 %v1570_v9 }
  0x44   :  { %1477 = vmatpush3.bf16.msra.mxu0 %v1570_v9  ;;  %1557 = vmatpush3.bf16.msra.mxu1 %v1570_v9 }
  0x47   :  { %1479 = vmatmul.mubr.bf16.vlgmr.msra.gmra.mrb[0].mxu0 %v1573_v10  ;;  %1511 = vmatmul.mubr.bf16.vlgmr.msra.gmra.mrb[0].mxu1 %v1574_v11 }
  0x48   :  { %1482 = vmatprep.mubr.bf16.mxu0 %v1575_v12  ;;  %1514 = vmatprep.mubr.bf16.mxu1 %v1576_v13 }
  0x4f   :  { %1483 = vmatmul.mubr.bf16.gmra.mrb[4].mxu0 %v1577_v14  ;;  %1515 = vmatmul.mubr.bf16.gmra.mrb[4].mxu1 %v1578_v15 }
  0x50   :  { %1486 = vmatprep.mubr.bf16.mxu0 %v1579_v16  ;;  %1518 = vmatprep.mubr.bf16.mxu1 %v1580_v17 }
  0x57   :  { %1487 = vmatmul.mubr.bf16.gmra.mrb[8].mxu0 %v1581_v18  ;;  %1519 = vmatmul.mubr.bf16.gmra.mrb[8].mxu1 %v1582_v19 }
  0x58   :  { %1490 = vmatprep.mubr.bf16.mxu0 %v1583_v20  ;;  %1522 = vmatprep.mubr.bf16.mxu1 %v1584_v21 }
  0x5f   :  { %1491 = vmatmul.mubr.bf16.gmra.mrb[12].mxu0 %v1585_v22  ;;  %1523 = vmatmul.mubr.bf16.gmra.mrb[12].mxu1 %v1586_v23 }
  0x60   :  { %1494 = vmatprep.mubr.bf16.mxu0 %v1587_v24  ;;  %1526 = vmatprep.mubr.bf16.mxu1 %v1588_v25 }
  0x67   :  { %1495 = vmatmul.mubr.bf16.gmra.mrb[16].mxu0 %v1589_v26  ;;  %1527 = vmatmul.mubr.bf16.gmra.mrb[16].mxu1 %v1590_v27 }
  0x68   :  { %1498 = vmatprep.mubr.bf16.mxu0 %v1591_v28  ;;  %1530 = vmatprep.mubr.bf16.mxu1 %v1592_v29 }
  0x6f   :  { %1499 = vmatmul.mubr.bf16.gmra.mrb[20].mxu0 %v1593_v30  ;;  %1531 = vmatmul.mubr.bf16.gmra.mrb[20].mxu1 %v1594_v31 }
  0x70   :  { %1502 = vmatprep.mubr.bf16.mxu0 %v1595_v32  ;;  %1534 = vmatprep.mubr.bf16.mxu1 %v1596_v33 }
  0x77   :  { %1503 = vmatmul.mubr.bf16.gmra.mrb[24].mxu0 %v1597_v34  ;;  %1535 = vmatmul.mubr.bf16.gmra.mrb[24].mxu1 %v1598_v35 }
  0x78   :  { %1506 = vmatprep.mubr.bf16.mxu0 %v1599_v36  ;;  %1538 = vmatprep.mubr.bf16.mxu1 %v1600_v37 }
  0x7f   :  { %1507 = vmatmul.mubr.bf16.gmra.mrb[28].mxu0 %v1601_v38  ;;  %1539 = vmatmul.mubr.bf16.gmra.mrb[28].mxu1 %v1602_v39 }
 0x11a   :  { %v1480_v41 = vpop.f32.mrb[0].mxu0  ;;  %v1512_v42 = vpop.f32.mrb[0].mxu1 }
 0x11b   :  { %v414_v43 = vadd.f32 %v1480_v41, %v1733_v40  ;;  %v542_v44 = vadd.f32 %v1512_v42, %v1733_v40  ;;  %v405_v45 = vpop.f32.mrb[1].mxu0  ;;  %v533_v46 = vpop.f32.mrb[1].mxu1 }
 0x11c   :  { %v406_v47 = vadd.f32 %v1733_v40, %v405_v45  ;;  %v534_v48 = vadd.f32 %v1733_v40, %v533_v46  ;;  %v1481_v49 = vpop.f32.mrb[2].mxu0  ;;  %v1513_v50 = vpop.f32.mrb[2].mxu1 }
 0x11d   :  { %v417_v51 = vadd.f32 %v1481_v49, %v1733_v40  ;;  %v545_v52 = vadd.f32 %v1513_v50, %v1733_v40  ;;  %v408_v53 = vpop.f32.mrb[3].mxu0  ;;  %v536_v54 = vpop.f32.mrb[3].mxu1  ;;  %v662_v57 = vmax.f32 %v414_v43, 0.0  ;;  %v694_v58 = vmax.f32 %v542_v44, 0.0 }
 0x11e   :  { %v409_v55 = vadd.f32 %v1733_v40, %v408_v53  ;;  %v537_v56 = vadd.f32 %v1733_v40, %v536_v54  ;;  %v660_v61 = vmax.f32 %v406_v47, 0.0  ;;  %v692_v62 = vmax.f32 %v534_v48, 0.0 }
 0x11f   :  { %v663_v59 = vmax.f32 %v417_v51, 0.0  ;;  %v695_v60 = vmax.f32 %v545_v52, 0.0 }
 0x120   :  { %v661_v63 = vmax.f32 %v409_v55, 0.0  ;;  %v693_v0 = vmax.f32 %v537_v56, 0.0 }
 0x121   :  { %v1239_v1 = vpack.c.bf16 %v663_v59, %v662_v57  ;;  %v1319_v2 = vpack.c.bf16 %v695_v60, %v694_v58 }
 0x122   :  { %v1234_v3 = vpack.c.bf16 %v661_v63, %v660_v61  ;;  %v1314_v4 = vpack.c.bf16 %v693_v0, %v692_v62  ;;  %v1484_v5 = vpop.f32.mrb[4].mxu0  ;;  %v1516_v6 = vpop.f32.mrb[4].mxu1 }
 0x123   :  { %1391 = vst [vmem:[#allocation7 + $0x8] sm:$0xff] %v1239_v1   ;;  %1407 = vst [vmem:[#allocation7 + $0x88] sm:$0xff] %v1319_v2   ;;  %v430_v7 = vadd.f32 %v1484_v5, %v1733_v40  ;;  %v558_v8 = vadd.f32 %v1516_v6, %v1733_v40  ;;  %v421_v9 = vpop.f32.mrb[5].mxu0  ;;  %v549_v10 = vpop.f32.mrb[5].mxu1 }
 0x124   :  { %1235 = vst [vmem:[#allocation7] sm:$0xff] %v1234_v3   ;;  %1406 = vst [vmem:[#allocation7 + $0x80] sm:$0xff] %v1314_v4   ;;  %v422_v11 = vadd.f32 %v1733_v40, %v421_v9  ;;  %v550_v12 = vadd.f32 %v1733_v40, %v549_v10  ;;  %v1485_v13 = vpop.f32.mrb[6].mxu0  ;;  %v1517_v14 = vpop.f32.mrb[6].mxu1 }
 0x125   :  { %v433_v15 = vadd.f32 %v1485_v13, %v1733_v40  ;;  %v561_v16 = vadd.f32 %v1517_v14, %v1733_v40  ;;  %v424_v17 = vpop.f32.mrb[7].mxu0  ;;  %v552_v18 = vpop.f32.mrb[7].mxu1  ;;  %v666_v21 = vmax.f32 %v430_v7, 0.0  ;;  %v698_v22 = vmax.f32 %v558_v8, 0.0 }
 0x126   :  { %v425_v19 = vadd.f32 %v1733_v40, %v424_v17  ;;  %v553_v20 = vadd.f32 %v1733_v40, %v552_v18  ;;  %v664_v25 = vmax.f32 %v422_v11, 0.0  ;;  %v696_v26 = vmax.f32 %v550_v12, 0.0 }
 0x127   :  { %v667_v23 = vmax.f32 %v433_v15, 0.0  ;;  %v699_v24 = vmax.f32 %v561_v16, 0.0 }
 0x128   :  { %v665_v27 = vmax.f32 %v425_v19, 0.0  ;;  %v697_v28 = vmax.f32 %v553_v20, 0.0 }
 0x129   :  { %v1249_v29 = vpack.c.bf16 %v667_v23, %v666_v21  ;;  %v1329_v30 = vpack.c.bf16 %v699_v24, %v698_v22 }
 0x12a   :  { %v1244_v31 = vpack.c.bf16 %v665_v27, %v664_v25  ;;  %v1324_v32 = vpack.c.bf16 %v697_v28, %v696_v26  ;;  %v1488_v33 = vpop.f32.mrb[8].mxu0  ;;  %v1520_v34 = vpop.f32.mrb[8].mxu1 }
 0x12b   :  { %1393 = vst [vmem:[#allocation7 + $0x18] sm:$0xff] %v1249_v29   ;;  %1409 = vst [vmem:[#allocation7 + $0x98] sm:$0xff] %v1329_v30   ;;  %v446_v35 = vadd.f32 %v1488_v33, %v1733_v40  ;;  %v574_v36 = vadd.f32 %v1520_v34, %v1733_v40  ;;  %v437_v37 = vpop.f32.mrb[9].mxu0  ;;  %v565_v38 = vpop.f32.mrb[9].mxu1 }
 0x12c   :  { %1392 = vst [vmem:[#allocation7 + $0x10] sm:$0xff] %v1244_v31   ;;  %1408 = vst [vmem:[#allocation7 + $0x90] sm:$0xff] %v1324_v32   ;;  %v438_v39 = vadd.f32 %v1733_v40, %v437_v37  ;;  %v566_v41 = vadd.f32 %v1733_v40, %v565_v38  ;;  %v1489_v42 = vpop.f32.mrb[10].mxu0  ;;  %v1521_v43 = vpop.f32.mrb[10].mxu1 }
 0x12d   :  { %v449_v44 = vadd.f32 %v1489_v42, %v1733_v40  ;;  %v577_v45 = vadd.f32 %v1521_v43, %v1733_v40  ;;  %v440_v46 = vpop.f32.mrb[11].mxu0  ;;  %v568_v47 = vpop.f32.mrb[11].mxu1  ;;  %v670_v50 = vmax.f32 %v446_v35, 0.0  ;;  %v702_v51 = vmax.f32 %v574_v36, 0.0 }
 0x12e   :  { %v441_v48 = vadd.f32 %v1733_v40, %v440_v46  ;;  %v569_v49 = vadd.f32 %v1733_v40, %v568_v47  ;;  %v668_v54 = vmax.f32 %v438_v39, 0.0  ;;  %v700_v55 = vmax.f32 %v566_v41, 0.0 }
 0x12f   :  { %v671_v52 = vmax.f32 %v449_v44, 0.0  ;;  %v703_v53 = vmax.f32 %v577_v45, 0.0 }
 0x130   :  { %v669_v56 = vmax.f32 %v441_v48, 0.0  ;;  %v701_v57 = vmax.f32 %v569_v49, 0.0 }
 0x131   :  { %v1259_v58 = vpack.c.bf16 %v671_v52, %v670_v50  ;;  %v1339_v59 = vpack.c.bf16 %v703_v53, %v702_v51 }
 0x132   :  { %v1254_v60 = vpack.c.bf16 %v669_v56, %v668_v54  ;;  %v1334_v61 = vpack.c.bf16 %v701_v57, %v700_v55  ;;  %v1492_v62 = vpop.f32.mrb[12].mxu0  ;;  %v1524_v63 = vpop.f32.mrb[12].mxu1 }
 0x133   :  { %1395 = vst [vmem:[#allocation7 + $0x28] sm:$0xff] %v1259_v58   ;;  %1411 = vst [vmem:[#allocation7 + $0xa8] sm:$0xff] %v1339_v59   ;;  %v462_v0 = vadd.f32 %v1492_v62, %v1733_v40  ;;  %v590_v1 = vadd.f32 %v1524_v63, %v1733_v40  ;;  %v453_v2 = vpop.f32.mrb[13].mxu0  ;;  %v581_v3 = vpop.f32.mrb[13].mxu1 }
 0x134   :  { %1394 = vst [vmem:[#allocation7 + $0x20] sm:$0xff] %v1254_v60   ;;  %1410 = vst [vmem:[#allocation7 + $0xa0] sm:$0xff] %v1334_v61   ;;  %v454_v4 = vadd.f32 %v1733_v40, %v453_v2  ;;  %v582_v5 = vadd.f32 %v1733_v40, %v581_v3  ;;  %v1493_v6 = vpop.f32.mrb[14].mxu0  ;;  %v1525_v7 = vpop.f32.mrb[14].mxu1 }
 0x135   :  { %v465_v8 = vadd.f32 %v1493_v6, %v1733_v40  ;;  %v593_v9 = vadd.f32 %v1525_v7, %v1733_v40  ;;  %v456_v10 = vpop.f32.mrb[15].mxu0  ;;  %v584_v11 = vpop.f32.mrb[15].mxu1  ;;  %v674_v14 = vmax.f32 %v462_v0, 0.0  ;;  %v706_v15 = vmax.f32 %v590_v1, 0.0 }
 0x136   :  { %v457_v12 = vadd.f32 %v1733_v40, %v456_v10  ;;  %v585_v13 = vadd.f32 %v1733_v40, %v584_v11  ;;  %v672_v18 = vmax.f32 %v454_v4, 0.0  ;;  %v704_v19 = vmax.f32 %v582_v5, 0.0 }
 0x137   :  { %v675_v16 = vmax.f32 %v465_v8, 0.0  ;;  %v707_v17 = vmax.f32 %v593_v9, 0.0 }
 0x138   :  { %v673_v20 = vmax.f32 %v457_v12, 0.0  ;;  %v705_v21 = vmax.f32 %v585_v13, 0.0 }
 0x139   :  { %v1269_v22 = vpack.c.bf16 %v675_v16, %v674_v14  ;;  %v1349_v23 = vpack.c.bf16 %v707_v17, %v706_v15 }
 0x13a   :  { %v1264_v24 = vpack.c.bf16 %v673_v20, %v672_v18  ;;  %v1344_v25 = vpack.c.bf16 %v705_v21, %v704_v19  ;;  %v1496_v26 = vpop.f32.mrb[16].mxu0  ;;  %v1528_v27 = vpop.f32.mrb[16].mxu1 }
 0x13b   :  { %1397 = vst [vmem:[#allocation7 + $0x38] sm:$0xff] %v1269_v22   ;;  %1413 = vst [vmem:[#allocation7 + $0xb8] sm:$0xff] %v1349_v23   ;;  %v478_v28 = vadd.f32 %v1496_v26, %v1733_v40  ;;  %v606_v29 = vadd.f32 %v1528_v27, %v1733_v40  ;;  %v469_v30 = vpop.f32.mrb[17].mxu0  ;;  %v597_v31 = vpop.f32.mrb[17].mxu1 }
 0x13c   :  { %1396 = vst [vmem:[#allocation7 + $0x30] sm:$0xff] %v1264_v24   ;;  %1412 = vst [vmem:[#allocation7 + $0xb0] sm:$0xff] %v1344_v25   ;;  %v470_v32 = vadd.f32 %v1733_v40, %v469_v30  ;;  %v598_v33 = vadd.f32 %v1733_v40, %v597_v31  ;;  %v1497_v34 = vpop.f32.mrb[18].mxu0  ;;  %v1529_v35 = vpop.f32.mrb[18].mxu1 }
 0x13d   :  { %v481_v36 = vadd.f32 %v1497_v34, %v1733_v40  ;;  %v609_v37 = vadd.f32 %v1529_v35, %v1733_v40  ;;  %v472_v38 = vpop.f32.mrb[19].mxu0  ;;  %v600_v39 = vpop.f32.mrb[19].mxu1  ;;  %v678_v43 = vmax.f32 %v478_v28, 0.0  ;;  %v710_v44 = vmax.f32 %v606_v29, 0.0 }
 0x13e   :  { %v473_v41 = vadd.f32 %v1733_v40, %v472_v38  ;;  %v601_v42 = vadd.f32 %v1733_v40, %v600_v39  ;;  %v676_v47 = vmax.f32 %v470_v32, 0.0  ;;  %v708_v48 = vmax.f32 %v598_v33, 0.0 }
 0x13f   :  { %v679_v45 = vmax.f32 %v481_v36, 0.0  ;;  %v711_v46 = vmax.f32 %v609_v37, 0.0 }
 0x140   :  { %v677_v49 = vmax.f32 %v473_v41, 0.0  ;;  %v709_v50 = vmax.f32 %v601_v42, 0.0 }
 0x141   :  { %v1279_v51 = vpack.c.bf16 %v679_v45, %v678_v43  ;;  %v1359_v52 = vpack.c.bf16 %v711_v46, %v710_v44 }
 0x142   :  { %v1274_v53 = vpack.c.bf16 %v677_v49, %v676_v47  ;;  %v1354_v54 = vpack.c.bf16 %v709_v50, %v708_v48  ;;  %v1500_v55 = vpop.f32.mrb[20].mxu0  ;;  %v1532_v56 = vpop.f32.mrb[20].mxu1 }
 0x143   :  { %1399 = vst [vmem:[#allocation7 + $0x48] sm:$0xff] %v1279_v51   ;;  %1415 = vst [vmem:[#allocation7 + $0xc8] sm:$0xff] %v1359_v52   ;;  %v494_v57 = vadd.f32 %v1500_v55, %v1733_v40  ;;  %v622_v58 = vadd.f32 %v1532_v56, %v1733_v40  ;;  %v485_v59 = vpop.f32.mrb[21].mxu0  ;;  %v613_v60 = vpop.f32.mrb[21].mxu1 }
 0x144   :  { %1398 = vst [vmem:[#allocation7 + $0x40] sm:$0xff] %v1274_v53   ;;  %1414 = vst [vmem:[#allocation7 + $0xc0] sm:$0xff] %v1354_v54   ;;  %v486_v61 = vadd.f32 %v1733_v40, %v485_v59  ;;  %v614_v62 = vadd.f32 %v1733_v40, %v613_v60  ;;  %v1501_v63 = vpop.f32.mrb[22].mxu0  ;;  %v1533_v0 = vpop.f32.mrb[22].mxu1 }
 0x145   :  { %v497_v1 = vadd.f32 %v1501_v63, %v1733_v40  ;;  %v625_v2 = vadd.f32 %v1533_v0, %v1733_v40  ;;  %v488_v3 = vpop.f32.mrb[23].mxu0  ;;  %v616_v4 = vpop.f32.mrb[23].mxu1  ;;  %v682_v7 = vmax.f32 %v494_v57, 0.0  ;;  %v714_v8 = vmax.f32 %v622_v58, 0.0 }
 0x146   :  { %v489_v5 = vadd.f32 %v1733_v40, %v488_v3  ;;  %v617_v6 = vadd.f32 %v1733_v40, %v616_v4  ;;  %v680_v11 = vmax.f32 %v486_v61, 0.0  ;;  %v712_v12 = vmax.f32 %v614_v62, 0.0 }
 0x147   :  { %v683_v9 = vmax.f32 %v497_v1, 0.0  ;;  %v715_v10 = vmax.f32 %v625_v2, 0.0 }
 0x148   :  { %v681_v13 = vmax.f32 %v489_v5, 0.0  ;;  %v713_v14 = vmax.f32 %v617_v6, 0.0 }
 0x149   :  { %v1289_v15 = vpack.c.bf16 %v683_v9, %v682_v7  ;;  %v1369_v16 = vpack.c.bf16 %v715_v10, %v714_v8 }
 0x14a   :  { %v1284_v17 = vpack.c.bf16 %v681_v13, %v680_v11  ;;  %v1364_v18 = vpack.c.bf16 %v713_v14, %v712_v12  ;;  %v1504_v19 = vpop.f32.mrb[24].mxu0  ;;  %v1536_v20 = vpop.f32.mrb[24].mxu1 }
 0x14b   :  { %1401 = vst [vmem:[#allocation7 + $0x58] sm:$0xff] %v1289_v15   ;;  %1417 = vst [vmem:[#allocation7 + $0xd8] sm:$0xff] %v1369_v16   ;;  %v510_v21 = vadd.f32 %v1504_v19, %v1733_v40  ;;  %v638_v22 = vadd.f32 %v1536_v20, %v1733_v40  ;;  %v501_v23 = vpop.f32.mrb[25].mxu0  ;;  %v629_v24 = vpop.f32.mrb[25].mxu1 }
 0x14c   :  { %1400 = vst [vmem:[#allocation7 + $0x50] sm:$0xff] %v1284_v17   ;;  %1416 = vst [vmem:[#allocation7 + $0xd0] sm:$0xff] %v1364_v18   ;;  %v502_v25 = vadd.f32 %v1733_v40, %v501_v23  ;;  %v630_v26 = vadd.f32 %v1733_v40, %v629_v24  ;;  %v1505_v27 = vpop.f32.mrb[26].mxu0  ;;  %v1537_v28 = vpop.f32.mrb[26].mxu1 }
 0x14d   :  { %v513_v29 = vadd.f32 %v1505_v27, %v1733_v40  ;;  %v641_v30 = vadd.f32 %v1537_v28, %v1733_v40  ;;  %v504_v31 = vpop.f32.mrb[27].mxu0  ;;  %v632_v32 = vpop.f32.mrb[27].mxu1  ;;  %v686_v35 = vmax.f32 %v510_v21, 0.0  ;;  %v718_v36 = vmax.f32 %v638_v22, 0.0 }
 0x14e   :  { %v505_v33 = vadd.f32 %v1733_v40, %v504_v31  ;;  %v633_v34 = vadd.f32 %v1733_v40, %v632_v32  ;;  %v684_v39 = vmax.f32 %v502_v25, 0.0  ;;  %v716_v41 = vmax.f32 %v630_v26, 0.0 }
 0x14f   :  { %v687_v37 = vmax.f32 %v513_v29, 0.0  ;;  %v719_v38 = vmax.f32 %v641_v30, 0.0 }
 0x150   :  { %v685_v42 = vmax.f32 %v505_v33, 0.0  ;;  %v717_v43 = vmax.f32 %v633_v34, 0.0 }
 0x151   :  { %v1299_v44 = vpack.c.bf16 %v687_v37, %v686_v35  ;;  %v1379_v45 = vpack.c.bf16 %v719_v38, %v718_v36 }
 0x152   :  { %v1294_v46 = vpack.c.bf16 %v685_v42, %v684_v39  ;;  %v1374_v47 = vpack.c.bf16 %v717_v43, %v716_v41  ;;  %v1508_v48 = vpop.f32.mrb[28].mxu0  ;;  %v1540_v49 = vpop.f32.mrb[28].mxu1 }
 0x153   :  { %1403 = vst [vmem:[#allocation7 + $0x68] sm:$0xff] %v1299_v44   ;;  %1419 = vst [vmem:[#allocation7 + $0xe8] sm:$0xff] %v1379_v45   ;;  %v526_v50 = vadd.f32 %v1508_v48, %v1733_v40  ;;  %v654_v51 = vadd.f32 %v1540_v49, %v1733_v40  ;;  %v517_v52 = vpop.f32.mrb[29].mxu0  ;;  %v645_v53 = vpop.f32.mrb[29].mxu1 }
 0x154   :  { %1402 = vst [vmem:[#allocation7 + $0x60] sm:$0xff] %v1294_v46   ;;  %1418 = vst [vmem:[#allocation7 + $0xe0] sm:$0xff] %v1374_v47   ;;  %v518_v54 = vadd.f32 %v1733_v40, %v517_v52  ;;  %v646_v55 = vadd.f32 %v1733_v40, %v645_v53  ;;  %v1509_v56 = vpop.f32.mrb[30].mxu0  ;;  %v1541_v57 = vpop.f32.mrb[30].mxu1 }
 0x155   :  { %v529_v58 = vadd.f32 %v1509_v56, %v1733_v40  ;;  %v657_v59 = vadd.f32 %v1541_v57, %v1733_v40  ;;  %v520_v60 = vpop.f32.mrb[31].mxu0  ;;  %v648_v61 = vpop.f32.mrb[31].mxu1  ;;  %v690_v0 = vmax.f32 %v526_v50, 0.0  ;;  %v722_v1 = vmax.f32 %v654_v51, 0.0 }
 0x156   :  { %v521_v62 = vadd.f32 %v1733_v40, %v520_v60  ;;  %v649_v63 = vadd.f32 %v1733_v40, %v648_v61  ;;  %v688_v4 = vmax.f32 %v518_v54, 0.0  ;;  %v720_v5 = vmax.f32 %v646_v55, 0.0 }
 0x157   :  { %v691_v2 = vmax.f32 %v529_v58, 0.0  ;;  %v723_v3 = vmax.f32 %v657_v59, 0.0 }
 0x158   :  { %v689_v6 = vmax.f32 %v521_v62, 0.0  ;;  %v721_v7 = vmax.f32 %v649_v63, 0.0 }
 0x159   :  { %v1309_v8 = vpack.c.bf16 %v691_v2, %v690_v0  ;;  %v1389_v9 = vpack.c.bf16 %v723_v3, %v722_v1 }
 0x15a   :  { %v1304_v10 = vpack.c.bf16 %v689_v6, %v688_v4  ;;  %v1384_v11 = vpack.c.bf16 %v721_v7, %v720_v5 }
 0x15b   :  { %1405 = vst [vmem:[#allocation7 + $0x78] sm:$0xff] %v1309_v8   ;;  %1421 = vst [vmem:[#allocation7 + $0xf8] sm:$0xff] %v1389_v9  }
 0x15c   :  { %1404 = vst [vmem:[#allocation7 + $0x70] sm:$0xff] %v1304_v10   ;;  %1420 = vst [vmem:[#allocation7 + $0xf0] sm:$0xff] %v1384_v11  }
 0x15d   :  { %1658 = shalt.err (!%p1655_p6)
}
 0x15e   :  { %s1659_s15 = scalar_lea.hbm %s1817_s3, 4096 }
 0x15f   :  { %p1660_p7 = scmp.ne.s32.totalorder %s1817_s3, %s1659_s15  ;;  %p1663_p8 = scmp.lt.u32.totalorder %s1659_s15, %s1817_s3 }
 0x161   :  { %p1665_p9 = pnand %p1663_p8, %p1660_p7 }
 0x163   :  { %1668 = shalt.err (!%p1665_p9)
}
 0x164   :  { %1055 = dma.vmem_to_hbm [thread:$0]  %s1050_s11, 4096, %s1817_s3, [#allocation4], %s1676_s22, %s1676_s22, %s1677_s23  }
 0x165   :  { %1673 = dma.done.wait [#allocation4], 4096  }
 0x166   :  { %1674 = vsyncadd [#allocation4], 4294963200 }
 0x167   :  { %1059 = vsyncpa [#allocation3], 1 }
 0x168   :  { %1060 = vsyncpa [#allocation6], 1 }
 0x169   :  { %1061 = vsyncpa [#allocation4], 1 }

</bundles_post_ra>
